<compile_context>
chip_gen: v6e
topology: v6e:2x2x1
jax: 0.10.0
libtpu: 0.0.40
codegen_flags: <defaults>
</compile_context>

<pallas_src>
import jax
import jax.numpy as jnp
from jax.experimental import pallas as pl
from jax.experimental.pallas import tpu as pltpu

_LANE = 128
_TINY_BYTES = 1 << 20                    # below this, plain jnp.sum wins
_SMALL_BLOCK_BYTES = 2 << 20             # below this, deepen input pipelining


def _round_up(x, m):
    return ((x + m - 1) // m) * m


def _vmem_budgets():
    """(double-buffered tile budget, vmem_limit_bytes) chosen per chip."""
    try:
        cap = int(pltpu.get_tpu_info().vmem_capacity_bytes)
    except Exception:
        cap = 0
    if cap >= 100 * 1024 * 1024:          # v5e / v6e: 128 MiB physical VMEM
        return 48 * 1024 * 1024, 96 * 1024 * 1024
    # v7x (64 MiB physical per TC) or unknown: conservative, safe everywhere.
    return 24 * 1024 * 1024, 48 * 1024 * 1024


def _vdn_sum_kernel(v_ref, o_ref):
    # v_ref: (TB, N, TF) block in VMEM; o_ref: (TB, TF) block in VMEM.
    # Reduce over the small static agent axis; kernel is HBM-bound so this is
    # never the critical slot.  Accumulate in f32 (floats) / int32 (ints).
    x = v_ref[...]
    if jnp.issubdtype(x.dtype, jnp.floating):
        acc = jnp.sum(x.astype(jnp.float32), axis=1)
    else:
        acc = jnp.sum(x.astype(jnp.int32), axis=1)
    o_ref[...] = acc.astype(o_ref.dtype)


def _vdn_mixer_pallas(v3, *, max_tb=1024, max_tf=2048):
    """Tiled Pallas sum over axis=1 of a (B, N, F) array (no input copies)."""
    B, N, F = v3.shape
    dtype = v3.dtype
    itemsize = dtype.itemsize
    budget, vmem_limit = _vmem_budgets()

    # Native sublane packing: f32 -> 8, bf16 -> 16, int8 -> 32 rows.
    sub = 8 * max(1, 4 // itemsize)
    n_pad = _round_up(N, sub)             # physical rows of the (N, tf) slab

    def _block_bytes(tb_, tf_):
        # double-buffered input (tb, n_pad, tf) + double-buffered output (tb, tf)
        return 2 * tb_ * (n_pad + 1) * tf_ * itemsize

    # Feature tile: lane-dense multiple of 128, grown toward full F first.
    f_rounded = _round_up(F, _LANE)
    tf = min(f_rounded, max(_LANE, _round_up(max_tf, _LANE)))
    while tf > _LANE and _block_bytes(sub, tf) > budget:
        tf = max(_LANE, (tf // 2) // _LANE * _LANE)

    # Batch tile: multiple of `sub`, from whatever budget remains.
    bytes_per_row = 2 * (n_pad + 1) * tf * itemsize
    tb_budget = max(sub, (budget // bytes_per_row) // sub * sub)
    tb = max(sub, min(_round_up(max_tb, sub), tb_budget, _round_up(B, sub)))

    # Guarantee >= 2 grid blocks when possible so both v7x TCs stream HBM.
    def _grid(tb_, tf_):
        return pl.cdiv(B, tb_), pl.cdiv(F, tf_)

    gb, gf = _grid(tb, tf)
    while gb * gf < 2 and tb > sub:
        tb = max(sub, (tb // 2) // sub * sub)
        gb, gf = _grid(tb, tf)
    while gb * gf < 2 and tf > _LANE:
        tf = max(_LANE, (tf // 2) // _LANE * _LANE)
        gb, gf = _grid(tb, tf)
    grid = (gb, gf)

    # Pad only the OUTPUT allocation to whole tiles (free; not a data copy) so
    # stores are unmasked lane-dense `vst`; slice back to (B, F) afterwards.
    b_out = gb * tb
    f_out = gf * tf

    in_block = (tb, N, tf)
    in_map = lambda i, j: (i, 0, j)
    in_bytes = tb * n_pad * tf * itemsize
    if in_bytes < _SMALL_BLOCK_BYTES and gb * gf >= 3:
        # Small blocks + many steps: deepen pipelining to hide DMA latency.
        try:
            in_spec = pl.BlockSpec(in_block, in_map, pipeline_mode=pl.Buffered(3))
        except TypeError:
            in_spec = pl.BlockSpec(in_block, in_map)
    else:
        in_spec = pl.BlockSpec(in_block, in_map)

    out = pl.pallas_call(
        _vdn_sum_kernel,
        out_shape=jax.ShapeDtypeStruct((b_out, f_out), dtype),
        grid=grid,
        in_specs=[in_spec],
        out_specs=pl.BlockSpec((tb, tf), lambda i, j: (i, j)),
        compiler_params=pltpu.CompilerParams(
            dimension_semantics=("parallel", "parallel"),
            vmem_limit_bytes=vmem_limit,
        ),
    )(v3)

    return out[:B, :F]


def vdn_mixer(values_n, states=None, *, force_pallas=False,
              max_tb=1024, max_tf=2048):
    """Pallas implementation of VDN_mixer.forward: sum over dim=1."""
    del states  # unused, matches the PyTorch signature
    values_n = jnp.asarray(values_n)
    assert values_n.ndim >= 2, "VDN mixer expects at least (batch, n_agents)"

    B, N = values_n.shape[0], values_n.shape[1]
    trailing = values_n.shape[2:]
    F = 1
    for d in trailing:
        F *= d

    # Tiny workloads (the usual VDN case: per-agent scalar values): launch
    # overhead dwarfs the work, and XLA can fuse the reduction with the loss.
    total_bytes = values_n.size * values_n.dtype.itemsize
    if not force_pallas and total_bytes < _TINY_BYTES:
        return jnp.sum(values_n, axis=1)

    # TODO(synk): for N far from the dtype sublane pack one could move the
    # agent axis to a third "arbitrary" grid axis with a pl.when accumulator;
    # kept in-block here since N is tiny and the kernel is HBM-bound.
    v3 = values_n.reshape(B, N, F)
    out = _vdn_mixer_pallas(v3, max_tb=max_tb, max_tf=max_tf)
    return out.reshape((B,) + trailing)


if __name__ == "__main__":
    key = jax.random.PRNGKey(0)
    k1, k2, k3, k4, k5 = jax.random.split(key, 5)

    # Case 1: classic small VDN-like shape; single ragged block (F=32 < 128).
    v1 = jax.random.normal(k1, (2, 8, 32), dtype=jnp.float32)
    out1 = jax.block_until_ready(vdn_mixer(v1, force_pallas=True))
    ref1 = jnp.sum(v1, axis=1)
    assert out1.shape == ref1.shape
    assert jnp.allclose(out1, ref1, atol=1e-5), "case 1 mismatch"

    # Case 2: multi-block grid (3 x 2), trailing dims (8, 32) -> F=256,
    # small blocks -> exercises the deepened-pipelining path.
    v2 = jax.random.normal(k2, (24, 4, 8, 32), dtype=jnp.float32)
    out2 = jax.block_until_ready(
        vdn_mixer(v2, force_pallas=True, max_tb=8, max_tf=128))
    ref2 = jnp.sum(v2, axis=1)
    assert out2.shape == ref2.shape
    assert jnp.allclose(out2, ref2, atol=1e-5), "case 2 mismatch"

    # Case 3: 2-D (batch, n_agents) input — F=1, single heavily-ragged block.
    v3 = jax.random.normal(k3, (2, 8), dtype=jnp.float32)
    out3 = jax.block_until_ready(vdn_mixer(v3, force_pallas=True))
    ref3 = jnp.sum(v3, axis=1)
    assert out3.shape == ref3.shape
    assert jnp.allclose(out3, ref3, atol=1e-5), "case 3 mismatch"
    out3b = jax.block_until_ready(vdn_mixer(v3))   # tiny-input bypass path
    assert jnp.allclose(out3b, ref3, atol=1e-5), "case 3 dispatch mismatch"

    # Case 4: bf16 input, f32 accumulation inside the kernel.
    v4 = jax.random.normal(k4, (16, 8, 64), dtype=jnp.float32).astype(jnp.bfloat16)
    out4 = jax.block_until_ready(vdn_mixer(v4, force_pallas=True))
    ref4 = jnp.sum(v4.astype(jnp.float32), axis=1).astype(jnp.bfloat16)
    assert out4.shape == ref4.shape
    assert jnp.allclose(out4.astype(jnp.float32), ref4.astype(jnp.float32),
                        atol=1e-2), "case 4 mismatch"

    # Case 5: ragged batch AND ragged feature tiles (B=20, N=3, F=200) with a
    # multi-block grid — edge-tile garbage must never reach valid columns.
    v5 = jax.random.normal(k5, (20, 3, 200), dtype=jnp.float32)
    out5 = jax.block_until_ready(
        vdn_mixer(v5, force_pallas=True, max_tb=8, max_tf=128))
    ref5 = jnp.sum(v5, axis=1)
    assert out5.shape == ref5.shape
    assert jnp.allclose(out5, ref5, atol=1e-5), "case 5 mismatch"

    print("KERNEL_OK")
</pallas_src>

<mosaic_0001>
module attributes {stable_mosaic.version = 11 : i64} {
  func.func @_vdn_sum_kernel(%arg0: i32, %arg1: i32, %arg2: memref<8x8x128xf32, #tpu.memory_space<vmem>>, %arg3: memref<8x128xf32, #tpu.memory_space<vmem>>) attributes {dimension_semantics = [#tpu.dimension_semantics<parallel>, #tpu.dimension_semantics<parallel>], iteration_bounds = array<i64: 1, 1>, scalar_prefetch = 0 : i64, scratch_operands = 0 : i64, tpu.core_type = #tpu.core_type<tc>, window_params = [{transform_indices = @transform_0, window_bounds = array<i64: 8, 8, 128>}, {transform_indices = @transform_1, window_bounds = array<i64: 8, 128>}]} {
    %c0 = arith.constant 0 : index
    %c0_0 = arith.constant 0 : index
    %c0_1 = arith.constant 0 : index
    %0 = vector.load %arg2[%c0, %c0_0, %c0_1] : memref<8x8x128xf32, #tpu.memory_space<vmem>>, vector<8x8x128xf32>
    %cst = arith.constant dense<0.000000e+00> : vector<8x128xf32>
    %1 = vector.multi_reduction <add>, %0, %cst [1] : vector<8x8x128xf32> to vector<8x128xf32>
    %c0_2 = arith.constant 0 : index
    %c0_3 = arith.constant 0 : index
    %2 = vector.load %arg3[%c0_2, %c0_3] : memref<8x128xf32, #tpu.memory_space<vmem>>, vector<8x128xf32>
    tpu.vector_store %arg3[%c0_2, %c0_3], %1 {strides = array<i32>} : memref<8x128xf32, #tpu.memory_space<vmem>>, vector<8x128xf32>,
    return
  }
  func.func @transform_0(%arg0: i32, %arg1: i32) -> (i32, i32, i32) {
    %c0_i32 = arith.constant 0 : i32
    %c0_i32_0 = arith.constant 0 : i32
    return %arg0, %c0_i32, %arg1 : i32, i32, i32
  }
  func.func @transform_1(%arg0: i32, %arg1: i32) -> (i32, i32) {
    %c0_i32 = arith.constant 0 : i32
    return %arg0, %arg1 : i32, i32
  }
}

</mosaic_0001>

<bundles_post_ra>
// kernel: tpu_custom_call.1
= control target key start
LH: loop header
LB: loop body
LE: loop exit
PB: predicated region body
PF: predicated region fallthrough
CT: control target
= control target key end

     0   :  { %6 = vsyncpa [#allocation3], 0  ;;  %s188_s0 = inlined_call_operand.hbm [shape: f32[2,8,32], index: 0, kind: input, shape index: {}]   ;;  %s189_s1 = inlined_call_operand.hbm [shape: f32[8,128], index: 1, kind: output, shape index: {}]  }
   0x1   :  { %7 = vsyncpa [#allocation4], 0 }
   0x2   :  { %12 = vsyncadd [#allocation3], 768  ;;  %s166_s6 = smov [#allocation2]  }
   0x3   :  { %s13_s7 = sshll.u32 %s166_s6, 4  ;;  %s14_s7 = int_to_ptr.vmem [resolvable:$true] %s13_s7 }
   0x4   :  { %s130_s8 = scalar_lea.vmem %s14_s7, 256  ;;  %s134_s9 = scalar_lea.vmem %s14_s7, 1024 }
   0x5   :  { %p131_p0 = scmp.ne.s32.totalorder %s14_s7, %s130_s8  ;;  %p135_p1 = scmp.lt.s32.totalorder %s14_s7, %s14_s7 }
   0x6   :  { %p136_p2 = scmp.lt.s32.totalorder %s134_s9, %s130_s8 }
   0x8   :  { %p137_p3 = por %p136_p2, %p135_p1 }
   0xa   :  { %p138_p4 = pnand %p137_p3, %p131_p0 }
   0xc   :  { %141 = shalt.err (!%p138_p4)
}
   0xd   :  { %s167_s10 = smov 128   ;;  %s168_s11 = smov 8  }
   0xe   :  { %19 = dma.hbm_to_vmem [thread:$0]  %s188_s0, 256, %s14_s7, [#allocation3], %s167_s10, %s167_s10, %s168_s11  }
   0xf   :  { %162 = dma.done.wait [#allocation3], 1024  }
  0x10   :  { %163 = vsyncadd [#allocation3], 4294966272  ;;  %v23_v0 = vld [vmem:[#allocation2] sm:$0xff]  ;;  %v24_v1 = vld [vmem:[#allocation2 + $0x8] sm:$0xff]  ;;  %vm87_vm0 = vcmask 1041409   ;;  %vm89_vm1 = vcmask 1042434  }
  0x11   :  { %v25_v2 = vld [vmem:[#allocation2 + $0x10] sm:$0xff]  ;;  %v26_v3 = vld [vmem:[#allocation2 + $0x18] sm:$0xff]  ;;  %v27_v4 = vld [vmem:[#allocation2 + $0x20] sm:$0xff]  ;;  %v31_v6 = vrot.slane %v23_v0, 4  ;;  %v37_v7 = vrot.slane %v24_v1, 4  ;;  %vm91_vm2 = vcmask 1043459  }
  0x12   :  { %v28_v5 = vld [vmem:[#allocation2 + $0x28] sm:$0xff]  ;;  %v43_v8 = vrot.slane %v25_v2, 4  ;;  %v29_v9 = vld [vmem:[#allocation2 + $0x30] sm:$0xff]  ;;  %v30_v10 = vld [vmem:[#allocation2 + $0x38] sm:$0xff]  ;;  %v49_v11 = vrot.slane %v26_v3, 4  ;;  %v55_v12 = vrot.slane %v27_v4, 4 }
  0x13   :  { %v61_v13 = vrot.slane %v28_v5, 4  ;;  %v32_v14 = vadd.f32 %v31_v6, %v23_v0  ;;  %v38_v15 = vadd.f32 %v37_v7, %v24_v1  ;;  %v67_v17 = vrot.slane %v29_v9, 4  ;;  %s169_s0 = smov [#allocation5]  }
  0x14   :  { %v44_v16 = vadd.f32 %v43_v8, %v25_v2  ;;  %v50_v18 = vadd.f32 %v49_v11, %v26_v3  ;;  %v56_v19 = vadd.f32 %v55_v12, %v27_v4  ;;  %v73_v21 = vrot.slane %v30_v10, 4  ;;  %s109_s14 = sshll.u32 %s169_s0, 4  ;;  %s110_s14 = int_to_ptr.vmem [resolvable:$true] %s109_s14 }
  0x15   :  { %v62_v20 = vadd.f32 %v61_v13, %v28_v5  ;;  %v33_v22 = vrot.slane %v32_v14, 2  ;;  %v39_v23 = vrot.slane %v38_v15, 2  ;;  %v68_v25 = vadd.f32 %v67_v17, %v29_v9  ;;  %s142_s15 = scalar_lea.vmem %s110_s14, 128  ;;  %p147_p6 = scmp.lt.s32.totalorder %s110_s14, %s110_s14 }
  0x16   :  { %v45_v24 = vrot.slane %v44_v16, 2  ;;  %v51_v26 = vrot.slane %v50_v18, 2  ;;  %v57_v27 = vrot.slane %v56_v19, 2  ;;  %v74_v29 = vadd.f32 %v73_v21, %v30_v10  ;;  %p143_p5 = scmp.ne.s32.totalorder %s110_s14, %s142_s15  ;;  %p148_p7 = scmp.lt.s32.totalorder %s142_s15, %s142_s15 }
  0x17   :  { %v63_v28 = vrot.slane %v62_v20, 2  ;;  %v34_v30 = vadd.f32 %v33_v22, %v32_v14  ;;  %v40_v31 = vadd.f32 %v39_v23, %v38_v15  ;;  %v69_v33 = vrot.slane %v68_v25, 2 }
  0x18   :  { %v46_v32 = vadd.f32 %v45_v24, %v44_v16  ;;  %v52_v34 = vadd.f32 %v51_v26, %v50_v18  ;;  %v58_v35 = vadd.f32 %v57_v27, %v56_v19  ;;  %v75_v37 = vrot.slane %v74_v29, 2  ;;  %p149_p8 = por %p148_p7, %p147_p6 }
  0x19   :  { %v64_v36 = vadd.f32 %v63_v28, %v62_v20  ;;  %v35_v38 = vrot.slane %v34_v30, 1  ;;  %v41_v39 = vrot.slane %v40_v31, 1  ;;  %v70_v41 = vadd.f32 %v69_v33, %v68_v25 }
  0x1a   :  { %v47_v40 = vrot.slane %v46_v32, 1  ;;  %v53_v42 = vrot.slane %v52_v34, 1  ;;  %v59_v43 = vrot.slane %v58_v35, 1  ;;  %v76_v45 = vadd.f32 %v75_v37, %v74_v29  ;;  %p150_p9 = pnand %p149_p8, %p143_p5 }
  0x1b   :  { %v65_v44 = vrot.slane %v64_v36, 1  ;;  %v36_v46 = vadd.f32 %v35_v38, %v34_v30  ;;  %v42_v47 = vadd.f32 %v41_v39, %v40_v31  ;;  %v71_v49 = vrot.slane %v70_v41, 1 }
  0x1c   :  { %v48_v48 = vadd.f32 %v47_v40, %v46_v32  ;;  %v54_v50 = vadd.f32 %v53_v42, %v52_v34  ;;  %v60_v51 = vadd.f32 %v59_v43, %v58_v35  ;;  %v77_v52 = vrot.slane %v76_v45, 1 }
  0x1d   :  { %v66_v53 = vadd.f32 %v65_v44, %v64_v36  ;;  %v88_v54 = vsel %vm87_vm0, %v42_v47, %v36_v46  ;;  %vm93_vm3 = vcmask 1044484   ;;  %v72_v55 = vadd.f32 %v71_v49, %v70_v41 }
  0x1e   :  { %v90_v56 = vsel %vm89_vm1, %v48_v48, %v88_v54  ;;  %vm95_vm4 = vcmask 1045509   ;;  %v78_v57 = vadd.f32 %v77_v52, %v76_v45  ;;  %vm97_vm5 = vcmask 1046534  }
  0x1f   :  { %v92_v58 = vsel %vm91_vm2, %v54_v50, %v90_v56  ;;  %vm99_vm6 = vcmask 1047559  }
  0x20   :  { %v94_v59 = vsel %vm93_vm3, %v60_v51, %v92_v58 }
  0x21   :  { %v96_v60 = vsel %vm95_vm4, %v66_v53, %v94_v59 }
  0x22   :  { %v98_v61 = vsel %vm97_vm5, %v72_v55, %v96_v60 }
  0x23   :  { %v100_v62 = vsel %vm99_vm6, %v78_v57, %v98_v61 }
  0x24   :  { %102 = vst [vmem:[#allocation5] sm:$0xff] %v100_v62 }
  0x25   :  { %153 = shalt.err (!%p150_p9)
}
  0x26   :  { %112 = dma.vmem_to_hbm [thread:$0]  %s110_s14, 128, %s189_s1, [#allocation4]  }
  0x27   :  { %164 = dma.done.wait [#allocation4], 128  }
  0x28   :  { %165 = vsyncadd [#allocation4], 4294967168 }
  0x29   :  { %116 = vsyncpa [#allocation3], 1 }
  0x2a   :  { %117 = vsyncpa [#allocation4], 1 }

</bundles_post_ra>
